<compile_context>
chip_gen: v6e
topology: v6e:2x2x1
jax: 0.10.0
libtpu: 0.0.40
codegen_flags: <defaults>
</compile_context>

<pallas_src>
import functools

import jax
import jax.numpy as jnp
import numpy as np
from jax.experimental import pallas as pl
from jax.experimental.pallas import tpu as pltpu


def _l2norm(x):
    # F.normalize(x, p=2, dim=1) with eps = 1e-12:  x / max(||x||, eps)
    ss = jnp.sum(x * x, axis=-1, keepdims=True)
    return x * jax.lax.rsqrt(jnp.maximum(ss, 1e-24))     # rsqrt -> EUP slot


def gcn_kernel(alpha_ref, x_ref, adj_ref, w_ref, b_ref, out_ref, *,
               subgraph_size, in_feats):
    S = subgraph_size
    F_in = in_feats

    W = w_ref[...]              # [F_in, F_out]
    bias = b_ref[...]           # [1, F_out]
    alpha = alpha_ref[0]        # scalar PReLU slope (SMEM)

    xp = x_ref[...]             # [TB, S*F_in]  node-packed features
    adj = adj_ref[...]          # [TB, S*S]     adj[t, i*S+j] = w(edge j -> i)
    TB = xp.shape[0]

    # Per-node feature slabs: static lane slices of the packed tile.
    x_nodes = [xp[:, j * F_in:(j + 1) * F_in] for j in range(S)]

    # Stage anchor features + the S aggregated rows into one [(S+1)*TB, F_in]
    # operand so a single MXU matmul covers both the anchor branch and the
    # GCN branch (instead of 5 tiny matmuls).  The j == 0 column is skipped:
    # the module zeroes the anchor-node features before the graph conv, so
    # that column contributes exactly zero.
    rows = [x_nodes[0]]
    for i in range(S):
        agg = adj[:, i * S + 1:i * S + 2] * x_nodes[1]     # [TB,1] * [TB,F_in]
        for j in range(2, S):
            agg = agg + adj[:, i * S + j:i * S + j + 1] * x_nodes[j]
        rows.append(agg)
    y = jnp.concatenate(rows, axis=0)                      # [(S+1)*TB, F_in]

    z = jnp.dot(y, W, preferred_element_type=jnp.float32) + bias
    z = jnp.where(z >= 0, z, alpha * z)                    # PReLU, one pass

    anchor_out = z[0:TB]                                   # [TB, F_out]
    pooled = z[TB:2 * TB]
    for i in range(2, S + 1):
        pooled = pooled + z[i * TB:(i + 1) * TB]
    pooled = pooled * (1.0 / S)                            # AvgPooling

    # Single lane-dense [TB, 2*F_out] store (128 lanes when F_out = 64).
    out_ref[...] = jnp.concatenate(
        [_l2norm(pooled), _l2norm(anchor_out)], axis=-1)


def _round_up(a, m):
    return (a + m - 1) // m * m


def one_layer_gcn_global_adg(x, adj_blocks, W, b, alpha, *, subgraph_size=4,
                             tile_b=512):
    """Forward of OneLayerGCNWithGlobalAdg_simple.

    x          : [N, F_in]   node features, N = B * subgraph_size
    adj_blocks : [B, S, S]   weighted block-diagonal adjacency (edge j -> i)
    W, b       : [F_in, F_out], [F_out]
    alpha      : [1]         PReLU slope
    returns (pooled_emb [B, F_out], anchor_emb [B, F_out]), both L2-normalized.
    """
    S = subgraph_size
    N, f_in = x.shape
    B = N // S
    f_out = W.shape[1]
    assert N == B * S and S >= 2

    # Free, contiguous reshapes (no extra HBM pass, no wrapper transposes).
    x_packed = x.reshape(B, S * f_in).astype(jnp.float32)         # [B, S*F_in]
    adj_flat = adj_blocks.reshape(B, S * S).astype(jnp.float32)   # [B, S*S]

    # Tile over subgraphs; clamp for small batches and pad B to a multiple of
    # the tile (padded rows are zeros and are sliced off afterwards).
    tile_b = int(max(8, _round_up(min(int(tile_b), _round_up(B, 8)), 8)))
    grid_b = pl.cdiv(B, tile_b)
    B_pad = grid_b * tile_b
    if B_pad != B:
        x_packed = jnp.pad(x_packed, ((0, B_pad - B), (0, 0)))
        adj_flat = jnp.pad(adj_flat, ((0, B_pad - B), (0, 0)))

    alpha1 = jnp.asarray(alpha, jnp.float32).reshape(1)
    b2 = b.reshape(1, f_out).astype(jnp.float32)
    W = W.astype(jnp.float32)

    # VMEM budget: double-buffered I/O blocks + lane-padded intermediates.
    def _pad128(n):
        return _round_up(n, 128)
    per_sub = 4 * (2 * _pad128(S * f_in) + 2 * _pad128(S * S)
                   + 2 * _pad128(2 * f_out) + (S + 1) * _pad128(f_in)
                   + (S + 1) * _pad128(f_out) + 6 * _pad128(f_out))
    est = tile_b * per_sub + 4 * _pad128(f_out) * (f_in + 2) + (1 << 20)
    # Floor at the common 32 MiB scoped default (raises v5e's 16 MiB default),
    # cap at 64 MiB to stay inside v7x's physical VMEM.
    vmem_limit = int(min(64 << 20, max(32 << 20, 2 * est)))

    kernel = functools.partial(gcn_kernel, subgraph_size=S, in_feats=f_in)
    out = pl.pallas_call(
        kernel,
        out_shape=jax.ShapeDtypeStruct((B_pad, 2 * f_out), jnp.float32),
        grid_spec=pltpu.PrefetchScalarGridSpec(
            num_scalar_prefetch=0,
            grid=(grid_b,),
            in_specs=[
                pl.BlockSpec(memory_space=pltpu.MemorySpace.SMEM),      # alpha
                pl.BlockSpec((tile_b, S * f_in), lambda t: (t, 0)),     # x
                pl.BlockSpec((tile_b, S * S), lambda t: (t, 0)),        # adj
                pl.BlockSpec((f_in, f_out), lambda t: (0, 0)),          # W
                pl.BlockSpec((1, f_out), lambda t: (0, 0)),             # b
            ],
            out_specs=pl.BlockSpec((tile_b, 2 * f_out), lambda t: (t, 0)),
        ),
        compiler_params=pltpu.CompilerParams(
            dimension_semantics=("parallel",),    # both TCs on v7x
            vmem_limit_bytes=vmem_limit),
    )(alpha1, x_packed, adj_flat, W, b2)

    out = out[:B]
    return out[:, :f_out], out[:, f_out:]


def reference(x, adj_blocks, W, b, alpha, subgraph_size=4):
    # Pure-JAX mirror of the PyTorch forward (dense adjacency, original
    # association adj @ (x_masked @ W)).
    def _prelu(v, a):
        return jnp.where(v >= 0, v, a * v)

    B, S, _ = adj_blocks.shape
    N = B * S
    adj = np.zeros((N, N), dtype=np.float32)
    blocks = np.asarray(adj_blocks)
    for bi in range(B):
        adj[bi * S:(bi + 1) * S, bi * S:(bi + 1) * S] = blocks[bi]
    adj = jnp.asarray(adj)
    a = alpha[0]

    anchor = x[0::S, :]
    anchor_out = _prelu(anchor @ W + b[None, :], a)
    row = np.arange(N)
    x_masked = jnp.where((row % S == 0)[:, None], 0.0, x)
    h = _prelu(adj @ (x_masked @ W) + b[None, :], a)
    pooled = h.reshape(B, S, -1).mean(axis=1)
    return _l2norm(pooled), _l2norm(anchor_out)


if __name__ == "__main__":
    B, S = 56, 4                # 56 subgraphs of 4 nodes each
    N = B * S                   # 224 nodes total
    in_feats, out_feats = 32, 64

    key = jax.random.PRNGKey(0)
    k_x, k_adj, k_w, k_b = jax.random.split(key, 4)

    # node features; anchor node = first node of each subgraph
    x = jax.random.normal(k_x, (N, in_feats), dtype=jnp.float32)

    # weighted within-subgraph adjacency (== bg.edata['w'] for fully connected
    # subgraphs); adj_blocks[b, i, j] = weight of edge j -> i
    adj_blocks = jax.random.uniform(k_adj, (B, S, S), dtype=jnp.float32)

    # parameters: Xavier-uniform weight, small bias (init is zero, but test a
    # general value), PReLU alpha = 0.25
    bound = float(np.sqrt(6.0 / (in_feats + out_feats)))
    W = jax.random.uniform(k_w, (in_feats, out_feats), dtype=jnp.float32,
                           minval=-bound, maxval=bound)
    b = 0.01 * jax.random.normal(k_b, (out_feats,), dtype=jnp.float32)
    alpha = jnp.array([0.25], dtype=jnp.float32)

    # tile_b=32 on a 56-subgraph batch exercises both the multi-step grid
    # (grid=2) and the zero-padding path (padded to 64 rows).
    pool_emb, anchor_emb = one_layer_gcn_global_adg(
        x, adj_blocks, W, b, alpha, subgraph_size=S, tile_b=32)
    jax.block_until_ready((pool_emb, anchor_emb))

    ref_pool, ref_anchor = reference(x, adj_blocks, W, b, alpha, S)
    np.testing.assert_allclose(np.asarray(pool_emb), np.asarray(ref_pool),
                               rtol=1e-4, atol=1e-4)
    np.testing.assert_allclose(np.asarray(anchor_emb), np.asarray(ref_anchor),
                               rtol=1e-4, atol=1e-4)

    print("KERNEL_OK")
</pallas_src>

<mosaic_0001>
module attributes {stable_mosaic.version = 11 : i64} {
  func.func @gcn_kernel(%arg0: i32, %arg1: memref<1xf32, #tpu.memory_space<smem>>, %arg2: memref<32x128xf32, #tpu.memory_space<vmem>>, %arg3: memref<32x16xf32, #tpu.memory_space<vmem>>, %arg4: memref<32x64xf32, #tpu.memory_space<vmem>>, %arg5: memref<1x64xf32, #tpu.memory_space<vmem>>, %arg6: memref<32x128xf32, #tpu.memory_space<vmem>>) attributes {dimension_semantics = [#tpu.dimension_semantics<parallel>], iteration_bounds = array<i64: 2>, scalar_prefetch = 0 : i64, scratch_operands = 0 : i64, tpu.core_type = #tpu.core_type<tc>, window_params = [{transform_indices = @transform_0, window_bounds = array<i64: 1>}, {transform_indices = @transform_1, window_bounds = array<i64: 32, 128>}, {transform_indices = @transform_2, window_bounds = array<i64: 32, 16>}, {pipeline_mode = #tpu.pipeline_mode<synchronous>, transform_indices = @transform_3, window_bounds = array<i64: 32, 64>}, {pipeline_mode = #tpu.pipeline_mode<synchronous>, transform_indices = @transform_4, window_bounds = array<i64: 1, 64>}, {transform_indices = @transform_5, window_bounds = array<i64: 32, 128>}]} {
    %c0 = arith.constant 0 : index
    %c0_0 = arith.constant 0 : index
    %0 = vector.load %arg4[%c0, %c0_0] : memref<32x64xf32, #tpu.memory_space<vmem>>, vector<32x64xf32>
    %c0_1 = arith.constant 0 : index
    %c0_2 = arith.constant 0 : index
    %1 = vector.load %arg5[%c0_1, %c0_2] : memref<1x64xf32, #tpu.memory_space<vmem>>, vector<1x64xf32>
    %c0_3 = arith.constant 0 : index
    %2 = memref.load %arg1[%c0_3] : memref<1xf32, #tpu.memory_space<smem>>
    %c0_4 = arith.constant 0 : index
    %c0_5 = arith.constant 0 : index
    %3 = vector.load %arg2[%c0_4, %c0_5] : memref<32x128xf32, #tpu.memory_space<vmem>>, vector<32x128xf32>
    %c0_6 = arith.constant 0 : index
    %c0_7 = arith.constant 0 : index
    %4 = vector.load %arg3[%c0_6, %c0_7] : memref<32x16xf32, #tpu.memory_space<vmem>>, vector<32x16xf32>
    %5 = vector.extract_strided_slice %3 {offsets = [0, 0], sizes = [32, 32], strides = [1, 1]} : vector<32x128xf32> to vector<32x32xf32>
    %6 = vector.extract_strided_slice %3 {offsets = [0, 32], sizes = [32, 32], strides = [1, 1]} : vector<32x128xf32> to vector<32x32xf32>
    %7 = vector.extract_strided_slice %3 {offsets = [0, 64], sizes = [32, 32], strides = [1, 1]} : vector<32x128xf32> to vector<32x32xf32>
    %8 = vector.extract_strided_slice %3 {offsets = [0, 96], sizes = [32, 32], strides = [1, 1]} : vector<32x128xf32> to vector<32x32xf32>
    %9 = vector.extract_strided_slice %4 {offsets = [0, 1], sizes = [32, 1], strides = [1, 1]} : vector<32x16xf32> to vector<32x1xf32>
    %10 = vector.broadcast %9 : vector<32x1xf32> to vector<32x32xf32>
    %11 = arith.mulf %10, %6 : vector<32x32xf32>
    %12 = vector.extract_strided_slice %4 {offsets = [0, 2], sizes = [32, 1], strides = [1, 1]} : vector<32x16xf32> to vector<32x1xf32>
    %13 = vector.broadcast %12 : vector<32x1xf32> to vector<32x32xf32>
    %14 = arith.mulf %13, %7 : vector<32x32xf32>
    %15 = arith.addf %11, %14 : vector<32x32xf32>
    %16 = vector.extract_strided_slice %4 {offsets = [0, 3], sizes = [32, 1], strides = [1, 1]} : vector<32x16xf32> to vector<32x1xf32>
    %17 = vector.broadcast %16 : vector<32x1xf32> to vector<32x32xf32>
    %18 = arith.mulf %17, %8 : vector<32x32xf32>
    %19 = arith.addf %15, %18 : vector<32x32xf32>
    %20 = vector.extract_strided_slice %4 {offsets = [0, 5], sizes = [32, 1], strides = [1, 1]} : vector<32x16xf32> to vector<32x1xf32>
    %21 = vector.broadcast %20 : vector<32x1xf32> to vector<32x32xf32>
    %22 = arith.mulf %21, %6 : vector<32x32xf32>
    %23 = vector.extract_strided_slice %4 {offsets = [0, 6], sizes = [32, 1], strides = [1, 1]} : vector<32x16xf32> to vector<32x1xf32>
    %24 = vector.broadcast %23 : vector<32x1xf32> to vector<32x32xf32>
    %25 = arith.mulf %24, %7 : vector<32x32xf32>
    %26 = arith.addf %22, %25 : vector<32x32xf32>
    %27 = vector.extract_strided_slice %4 {offsets = [0, 7], sizes = [32, 1], strides = [1, 1]} : vector<32x16xf32> to vector<32x1xf32>
    %28 = vector.broadcast %27 : vector<32x1xf32> to vector<32x32xf32>
    %29 = arith.mulf %28, %8 : vector<32x32xf32>
    %30 = arith.addf %26, %29 : vector<32x32xf32>
    %31 = vector.extract_strided_slice %4 {offsets = [0, 9], sizes = [32, 1], strides = [1, 1]} : vector<32x16xf32> to vector<32x1xf32>
    %32 = vector.broadcast %31 : vector<32x1xf32> to vector<32x32xf32>
    %33 = arith.mulf %32, %6 : vector<32x32xf32>
    %34 = vector.extract_strided_slice %4 {offsets = [0, 10], sizes = [32, 1], strides = [1, 1]} : vector<32x16xf32> to vector<32x1xf32>
    %35 = vector.broadcast %34 : vector<32x1xf32> to vector<32x32xf32>
    %36 = arith.mulf %35, %7 : vector<32x32xf32>
    %37 = arith.addf %33, %36 : vector<32x32xf32>
    %38 = vector.extract_strided_slice %4 {offsets = [0, 11], sizes = [32, 1], strides = [1, 1]} : vector<32x16xf32> to vector<32x1xf32>
    %39 = vector.broadcast %38 : vector<32x1xf32> to vector<32x32xf32>
    %40 = arith.mulf %39, %8 : vector<32x32xf32>
    %41 = arith.addf %37, %40 : vector<32x32xf32>
    %42 = vector.extract_strided_slice %4 {offsets = [0, 13], sizes = [32, 1], strides = [1, 1]} : vector<32x16xf32> to vector<32x1xf32>
    %43 = vector.broadcast %42 : vector<32x1xf32> to vector<32x32xf32>
    %44 = arith.mulf %43, %6 : vector<32x32xf32>
    %45 = vector.extract_strided_slice %4 {offsets = [0, 14], sizes = [32, 1], strides = [1, 1]} : vector<32x16xf32> to vector<32x1xf32>
    %46 = vector.broadcast %45 : vector<32x1xf32> to vector<32x32xf32>
    %47 = arith.mulf %46, %7 : vector<32x32xf32>
    %48 = arith.addf %44, %47 : vector<32x32xf32>
    %49 = vector.extract_strided_slice %4 {offsets = [0, 15], sizes = [32, 1], strides = [1, 1]} : vector<32x16xf32> to vector<32x1xf32>
    %50 = vector.broadcast %49 : vector<32x1xf32> to vector<32x32xf32>
    %51 = arith.mulf %50, %8 : vector<32x32xf32>
    %52 = arith.addf %48, %51 : vector<32x32xf32>
    %53 = tpu.concatenate %5, %19, %30, %41, %52 in 0 : vector<32x32xf32>, vector<32x32xf32>, vector<32x32xf32>, vector<32x32xf32>, vector<32x32xf32> -> vector<160x32xf32>
    %cst = arith.constant dense<0.000000e+00> : vector<160x64xf32>
    %54 = tpu.matmul %53, %0, %cst {dimension_numbers = #tpu.dot_dimension_numbers<[1], [0], [0], [1], [0, 0, 1, 1], [], []>} : vector<160x32xf32>, vector<32x64xf32>, vector<160x64xf32> -> vector<160x64xf32>
    %55 = vector.broadcast %1 : vector<1x64xf32> to vector<160x64xf32>
    %56 = arith.addf %54, %55 : vector<160x64xf32>
    %cst_8 = arith.constant 0.000000e+00 : f32
    %57 = vector.broadcast %cst_8 : f32 to vector<160x64xf32>
    %58 = arith.cmpf oge, %56, %57 : vector<160x64xf32>
    %59 = vector.broadcast %2 : f32 to vector<160x64xf32>
    %60 = arith.mulf %59, %56 : vector<160x64xf32>
    %61 = arith.select %58, %56, %60 : vector<160x64xi1>, vector<160x64xf32>
    %62 = vector.extract_strided_slice %61 {offsets = [0, 0], sizes = [32, 64], strides = [1, 1]} : vector<160x64xf32> to vector<32x64xf32>
    %63 = vector.extract_strided_slice %61 {offsets = [32, 0], sizes = [32, 64], strides = [1, 1]} : vector<160x64xf32> to vector<32x64xf32>
    %64 = vector.extract_strided_slice %61 {offsets = [64, 0], sizes = [32, 64], strides = [1, 1]} : vector<160x64xf32> to vector<32x64xf32>
    %65 = arith.addf %63, %64 : vector<32x64xf32>
    %66 = vector.extract_strided_slice %61 {offsets = [96, 0], sizes = [32, 64], strides = [1, 1]} : vector<160x64xf32> to vector<32x64xf32>
    %67 = arith.addf %65, %66 : vector<32x64xf32>
    %68 = vector.extract_strided_slice %61 {offsets = [128, 0], sizes = [32, 64], strides = [1, 1]} : vector<160x64xf32> to vector<32x64xf32>
    %69 = arith.addf %67, %68 : vector<32x64xf32>
    %cst_9 = arith.constant 2.500000e-01 : f32
    %70 = vector.broadcast %cst_9 : f32 to vector<32x64xf32>
    %71 = arith.mulf %69, %70 : vector<32x64xf32>
    %72 = arith.mulf %71, %71 : vector<32x64xf32>
    %cst_10 = arith.constant dense<0.000000e+00> : vector<32xf32>
    %73 = vector.multi_reduction <add>, %72, %cst_10 [1] : vector<32x64xf32> to vector<32xf32>
    %74 = vector.shape_cast %73 : vector<32xf32> to vector<32x1xf32>
    %cst_11 = arith.constant 1.000000e-24 : f32
    %75 = vector.broadcast %cst_11 : f32 to vector<32x1xf32>
    %76 = arith.maximumf %74, %75 : vector<32x1xf32>
    %77 = math.rsqrt %76 : vector<32x1xf32>
    %78 = vector.broadcast %77 : vector<32x1xf32> to vector<32x64xf32>
    %79 = arith.mulf %71, %78 : vector<32x64xf32>
    %80 = arith.mulf %62, %62 : vector<32x64xf32>
    %cst_12 = arith.constant dense<0.000000e+00> : vector<32xf32>
    %81 = vector.multi_reduction <add>, %80, %cst_12 [1] : vector<32x64xf32> to vector<32xf32>
    %82 = vector.shape_cast %81 : vector<32xf32> to vector<32x1xf32>
    %cst_13 = arith.constant 1.000000e-24 : f32
    %83 = vector.broadcast %cst_13 : f32 to vector<32x1xf32>
    %84 = arith.maximumf %82, %83 : vector<32x1xf32>
    %85 = math.rsqrt %84 : vector<32x1xf32>
    %86 = vector.broadcast %85 : vector<32x1xf32> to vector<32x64xf32>
    %87 = arith.mulf %62, %86 : vector<32x64xf32>
    %88 = tpu.concatenate %79, %87 in 1 : vector<32x64xf32>, vector<32x64xf32> -> vector<32x128xf32>
    %c0_14 = arith.constant 0 : index
    %c0_15 = arith.constant 0 : index
    %89 = vector.load %arg6[%c0_14, %c0_15] : memref<32x128xf32, #tpu.memory_space<vmem>>, vector<32x128xf32>
    tpu.vector_store %arg6[%c0_14, %c0_15], %88 {strides = array<i32>} : memref<32x128xf32, #tpu.memory_space<vmem>>, vector<32x128xf32>,
    return
  }
  func.func @transform_0(%arg0: i32) -> i32 {
    %c0_i32 = arith.constant 0 : i32
    %c0_i32_0 = arith.constant 0 : i32
    return %c0_i32 : i32
  }
  func.func @transform_1(%arg0: i32) -> (i32, i32) {
    %c0_i32 = arith.constant 0 : i32
    %c0_i32_0 = arith.constant 0 : i32
    return %arg0, %c0_i32 : i32, i32
  }
  func.func @transform_2(%arg0: i32) -> (i32, i32) {
    %c0_i32 = arith.constant 0 : i32
    %c0_i32_0 = arith.constant 0 : i32
    return %arg0, %c0_i32 : i32, i32
  }
  func.func @transform_3(%arg0: i32) -> (i32, i32) {
    %c0_i32 = arith.constant 0 : i32
    %c0_i32_0 = arith.constant 0 : i32
    %c0_i32_1 = arith.constant 0 : i32
    return %c0_i32, %c0_i32_0 : i32, i32
  }
  func.func @transform_4(%arg0: i32) -> (i32, i32) {
    %c0_i32 = arith.constant 0 : i32
    %c0_i32_0 = arith.constant 0 : i32
    %c0_i32_1 = arith.constant 0 : i32
    return %c0_i32, %c0_i32_0 : i32, i32
  }
  func.func @transform_5(%arg0: i32) -> (i32, i32) {
    %c0_i32 = arith.constant 0 : i32
    %c0_i32_0 = arith.constant 0 : i32
    return %arg0, %c0_i32 : i32, i32
  }
}

</mosaic_0001>

<bundles_post_ra>
// kernel: tpu_custom_call.1
= control target key start
LH: loop header
LB: loop body
LE: loop exit
PB: predicated region body
PF: predicated region fallthrough
CT: control target
= control target key end

     0   :  { %s1985_s0 = inlined_call_operand.<no memory space> [shape: f32[1], index: 0, kind: input, shape index: {}]   ;;  %s1986_s1 = inlined_call_operand.vmem [shape: f32[64,128], index: 1, kind: input, shape index: {}]   ;;  %s1987_s2 = inlined_call_operand.vmem [shape: f32[64,16], index: 2, kind: input, shape index: {}]   ;;  %s1988_s3 = inlined_call_operand.hbm [shape: f32[32,64], index: 3, kind: input, shape index: {}]   ;;  %s1989_s4 = inlined_call_operand.vmem [shape: f32[1,64], index: 4, kind: input, shape index: {}]   ;;  %s1990_s5 = inlined_call_operand.hbm [shape: f32[64,128], index: 5, kind: output, shape index: {}]  }
   0x1   :  { %10 = sst [smem:[#allocation2]] %s1985_s0 }
   0x2   :  { %11 = vsyncpa [#allocation4], 0 }
   0x3   :  { %12 = vsyncpa [#allocation5], 0 }
   0x4   :  { %14 = vsyncpa [#allocation5 + $0x1], 0  ;;  %s1575_s20 = smov 0   ;;  %s1577_s21 = smov 0  }
   0x5   :  { %s1579_s22 = smov 0   ;;  %s1581_s23 = smov 0  }
   0x6 LB: > { %s1596_s0 = sadd.s32 4294967295, %s1520_s23   ;;  %s1204_s24 = sadd.s32 4294967294, %s1520_s23   ;;  %s1520_s23 = sphi %s1581_s23, %s1998_s23   ;;  %s1516_s22 = sphi %s1579_s22, %s1997_s22   ;;  %s1512_s21 = sphi %s1577_s21, %s1996_s21   ;;  %s1508_s20 = sphi %s1575_s20, %s1995_s20  }
   0x7   : > { %s1600_s25 = sadd.s32 1, %s1520_s23   ;;  %s142_s26 = sadd.s32 1, %s1516_s22 }
   0x8   : > { %s139_s27 = ssub.s32 %s1520_s23, %s1600_s25  ;;  %p152_p0 = scmp.ne.s32.totalorder %s1516_s22, %s1512_s21 }
   0x9   : > { %p140_p1 = scmp.eq.s32.totalorder %s139_s27, 0  ;;  %p153_p2 = scmp.eq.s32.totalorder %s1596_s0, 1 }
   0xa   : > { %p158_p3 = scmp.ne.s32.totalorder %s1512_s21, %s1508_s20  ;;  %p159_p4 = scmp.eq.s32.totalorder %s1204_s24, 1 }
   0xb   : > { %s1611_s28 = scalar_select %p140_p1, %s1516_s22, %s142_s26  }
   0xc   : > { %p1613_p5 = por %p153_p2, %p152_p0  ;;  %p1617_p6 = por %p159_p4, %p158_p3 }
   0xd   : > { %p1205_p7 = scmp.ge.s32.totalorder %s1520_s23, 1  ;;  %p166_p8 = scmp.lt.s32.totalorder %s1520_s23, 3 }
   0xe   : > { %s1992_s30 = scalar_select %p1617_p6, 1, 0 }
   0xf   : > { %p1326_p9 = scmp.eq.s32.totalorder %s1596_s0, 0  ;;  %p1624_p10 = pnand %p1205_p7, %p166_p8 }
  0x10   : > { %s1522_s7 = smov [#allocation3]  }
  0x11   : > { %s181_s8 = sshll.u32 %s1522_s7, 4  ;;  %p1318_p11 = pneg %p1624_p10  ;;  %s182_s8 = int_to_ptr.vmem [resolvable:$true] %s181_s8 }
  0x12   : > { %s1441_s9 = scalar_lea.vmem %s182_s8, 512  ;;  %p1449_p3 = scmp.lt.s32.totalorder %s182_s8, %s182_s8 }
  0x13   : > { %p1319_p12 = pnand %p1326_p9, %p1318_p11  ;;  %p1442_p0 = scmp.ne.s32.totalorder %s182_s8, %s1441_s9 }
  0x14   : > { %p1450_p4 = scmp.lt.s32.totalorder %s1441_s9, %s1441_s9 }
  0x15   : > { %p1432_p13 = pneg %p1319_p12 }
  0x16   : > { %p1451_p6 = por %p1450_p4, %p1449_p3 }
  0x17   : > { %p1444_p1 = pnand %p1442_p0, %p1432_p13 }
  0x19   : > { %p1445_p2 = pneg %p1444_p1 }
  0x1b   : > { %p1452_p7 = pnand %p1451_p6, %p1445_p2 }
  0x1d   : > { %1455 = shalt.err (!%p1452_p7)
}
  0x1e   : > { %s1523_s10 = smov 128   ;;  %s1524_s11 = smov 8  }
  0x1f   : > { %1321 = dma.hbm_to_vmem [thread:$0]  (!%p1319_p12), %s1988_s3, 512, %s182_s8, [#allocation4], %s1523_s10, %s1523_s10, %s1524_s11  }
  0x20   : > { %218 = sbr.rel (%p1624_p10) target bundleno = 887 (0x377), region = 40 }
  0x25   : > { %1499 = dma.done.wait (%p1326_p9), [#allocation4], 512  }
  0x26   : > { %1501 = vsyncadd (%p1326_p9), [#allocation4], 4294966784  ;;  %s1211_s14 = sshll.u32 %s1596_s0, 2  ;;  %v1525_v0 = vmov 2   ;;  %v1526_v1 = vmov 7   ;;  %v1527_v6 = vmov 10  }
  0x27   : > { %1381 = vset.pattern.permute.xlu0 %v1525_v0  ;;  %p252_p6 = scmp.lt.s32.totalorder %s1211_s14, 7  ;;  %1380 = vset.pattern.permute.xlu1 %v1526_v1  ;;  %v1528_v7 = vmov 3   ;;  %v1529_v8 = vmov 11   ;;  %v1530_v9 = vmov 6   ;;  %v1531_v10 = vmov 14   ;;  %v267_v11 = vld [vmem:[#allocation3 + $0x18] sm:$0xff] }
  0x28   : > { %1266 = vmatprep.subr.mxu0 %v267_v11  ;;  %v266_v12 = vld [vmem:[#allocation3 + $0x10] sm:$0xff]  ;;  %1304 = vmatprep.subr.mxu1 %v267_v11  ;;  %v1532_v13 = vmov 15   ;;  %v265_v14 = vld [vmem:[#allocation3 + $0x8] sm:$0xff]  ;;  %v264_v15 = vld [vmem:[#allocation3] sm:$0xff]  ;;  %vm736_vm0 = vcmask 261120   ;;  %v1533_v19 = vmov 9  }
  0x29   : > { %s2000_s14 = smov (!%p252_p6, %s1211_s14), 7  ;;  %1267 = vmatpush3.msra.mxu0 %v267_v11  ;;  %1308 = vmatpush3.msra.mxu1 %v267_v11  ;;  %v1534_v21 = vmov 1   ;;  %v1535_v22 = vmov 5   ;;  %v1536_v23 = vmov 13   ;;  %s1537_s27 = smov 96   ;;  %vm1027_vm4 = vcmask 523264  }
  0x2a   : > { %s1212_s15 = sshll.u32 %s2000_s14, 3  ;;  %1268 = vmatprep.subr.mxu0 %v266_v12  ;;  %1305 = vmatprep.subr.mxu1 %v266_v12  ;;  %s1538_s6 = smov 64  }
  0x2b   : > { %s261_s18 = scalar_lea.vmem %s1987_s2, %s1212_s15  ;;  %s255_s26 = scalar_lea.vmem %s1986_s1, %s1212_s15  ;;  %1269 = vmatpush3.msra.mxu0 %v266_v12  ;;  %1309 = vmatpush3.msra.mxu1 %v266_v12 }
  0x2c   : > { %v1651_v2 = vld [vmem:[%s261_s18] sm:$0xff]  ;;  %v1653_v3 = vld [vmem:[%s261_s18 + $0x10] sm:$0xff]  ;;  %v1657_v4 = vld [vmem:[%s261_s18 + $0x18] sm:$0xff]  ;;  %1270 = vmatprep.subr.mxu0 %v265_v14  ;;  %1306 = vmatprep.subr.mxu1 %v265_v14  ;;  %s269_s7 = sld [smem:[#allocation2]]  ;;  %s248_s10 = sand.u32 1, %s1512_s21  }
  0x2d   : > { %303 = vperm.xlu0 %1381, %v1651_v2   ;;  %451 = vperm.xlu1 %1380, %v1653_v3   ;;  %v1659_v5 = vld [vmem:[%s261_s18 + $0x8] sm:$0xff]  ;;  %v1688_v16 = vld [vmem:[%s255_s26] sm:$0xff]  ;;  %v1695_v18 = vld [vmem:[%s255_s26 + $0x10] sm:$0xff]  ;;  %s1210_s11 = sshll.u32 %s248_s10, 5  ;;  %s1241_s14 = sshll.u32 %s1596_s0, 9 }
  0x2e   : > { %1271 = vmatpush3.msra.mxu0 %v265_v14  ;;  %1274 = vmatprep.mubr.msk.f32.mxu0 %vm736_vm0, %v1688_v16  ;;  %v1693_v17 = vld [vmem:[%s255_s26 + $0x8] sm:$0xff]  ;;  %v1702_v20 = vld [vmem:[%s255_s26 + $0x18] sm:$0xff]  ;;  %s250_s12 = scalar_lea.vmem [#allocation6], %s1210_s11  ;;  %s1942_s17 = scalar_lea.hbm %s1990_s5, %s1241_s14 }
  0x2f   : > { %1272 = vmatprep.subr.mxu0 %v264_v15  ;;  %1310 = vmatpush3.msra.mxu1 %v265_v14  ;;  %s1118_s13 = sshll.u32 %s250_s12, 4  ;;  %s1945_s0 = scalar_lea.sflag [#allocation5], %s248_s10  ;;  %s1936_s13 = int_to_ptr.vmem [resolvable:$true] %s1118_s13 }
  0x30   : > { %1273 = vmatpush3.msra.mxu0 %v264_v15  ;;  %1307 = vmatprep.subr.mxu1 %v264_v15  ;;  %s1456_s18 = scalar_lea.vmem %s1936_s13, 512  ;;  %s1539_s19 = smov [#allocation6]  }
  0x31   : > { %1384 = vset.pattern.permute.xlu0 %v1527_v6  ;;  %455 = vperm.xlu1 %1380, %v1657_v4   ;;  %p1457_p8 = scmp.ne.s32.totalorder %s1936_s13, %s1456_s18  ;;  %s1460_s24 = sshll.u32 %s1539_s19, 4  ;;  %s1461_s24 = int_to_ptr.vmem [resolvable:$false] %s1460_s24 }
  0x32   : > { %507 = vperm.xlu0 %1384, %v1659_v5   ;;  %1275 = vmatmul.mubr.msk.f32.vlgmr.msra.gmra.mxu0 %vm736_vm0, %v1693_v17  ;;  %s1462_s26 = scalar_lea.vmem %s1461_s24, 1024  ;;  %p1463_p11 = scmp.lt.s32.totalorder %s1936_s13, %s1461_s24 }
  0x33   : > { %1277 = vmatprep.mubr.msk.f32.mxu0 %vm736_vm0, %v1695_v18  ;;  %1311 = vmatpush3.msra.mxu1 %v264_v15  ;;  %p1458_p9 = pnand %p1457_p8, %p1613_p5  ;;  %p1464_p12 = scmp.lt.s32.totalorder %s1462_s26, %s1456_s18 }
  0x35   : > { %1382 = vset.pattern.permute.xlu1 %v1527_v6  ;;  %p1459_p10 = pneg %p1458_p9  ;;  %p1465_p13 = por %p1464_p12, %p1463_p11 }
  0x36   : > { %511 = vperm.xlu0 %1384, %v1653_v3   ;;  %503 = vperm.xlu1 %1382, %v1651_v2  }
  0x37   : > { %1278 = vmatmul.mubr.msk.f32.gmra.mxu0 %vm736_vm0, %v1702_v20  ;;  %p1466_p0 = pnand %p1465_p13, %p1459_p10 }
  0x3a   : > { %1388 = vset.pattern.permute.xlu0 %v1528_v7  ;;  %1383 = vset.pattern.permute.xlu1 %v1525_v0 }
  0x3b   : > { %347 = vperm.xlu0 %1388, %v1659_v5   ;;  %307 = vperm.xlu1 %1383, %v1659_v5  }
  0x3f   : > { %351 = vperm.xlu0 %1388, %v1653_v3   ;;  %1385 = vset.pattern.permute.xlu1 %v1528_v7 }
  0x40   : > { %343 = vperm.xlu1 %1385, %v1651_v2  }
  0x43   : > { %1392 = vset.pattern.permute.xlu0 %v1529_v8 }
  0x44   : > { %555 = vperm.xlu0 %1392, %v1657_v4   ;;  %1386 = vset.pattern.permute.xlu1 %v1529_v8 }
  0x45   : > { %543 = vperm.xlu1 %1386, %v1651_v2  }
  0x48   : > { %1393 = vset.pattern.permute.xlu0 %v1530_v9 }
  0x49   : > { %411 = vperm.xlu0 %1393, %v1653_v3   ;;  %547 = vperm.xlu1 %1386, %v1659_v5  }
  0x4d   : > { %415 = vperm.xlu0 %1393, %v1657_v4   ;;  %1387 = vset.pattern.permute.xlu1 %v1525_v0 }
  0x4e   : > { %311 = vperm.xlu1 %1387, %v1653_v3  }
  0x51   : > { %407 = vperm.xlu0 %1393, %v1659_v5  }
  0x52   : > { %315 = vperm.xlu1 %1387, %v1657_v4  }
  0x55   : > { %1398 = vset.pattern.permute.xlu0 %v1531_v10 }
  0x56   : > { %1389 = vset.pattern.permute.xlu1 %v1527_v6  ;;  %611 = vperm.xlu0 %1398, %v1653_v3  }
  0x57   : > { %515 = vperm.xlu1 %1389, %v1657_v4  }
  0x5a   : > { %1399 = vset.pattern.permute.xlu0 %v1532_v13 }
  0x5b   : > { %1390 = vset.pattern.permute.xlu1 %v1529_v8  ;;  %643 = vperm.xlu0 %1399, %v1651_v2  }
  0x5c   : > { %551 = vperm.xlu1 %1390, %v1653_v3  }
  0x5f   : > { %655 = vperm.xlu0 %1399, %v1657_v4  }
  0x60   : > { %1391 = vset.pattern.permute.xlu1 %v1528_v7 }
  0x61   : > { %355 = vperm.xlu1 %1391, %v1657_v4  }
  0x63   : > { %1405 = vset.pattern.permute.xlu0 %v1533_v19 }
  0x64   : > { %487 = vperm.xlu0 %1405, %v1659_v5  }
  0x65   : > { %1394 = vset.pattern.permute.xlu1 %v1530_v9 }
  0x66   : > { %403 = vperm.xlu1 %1394, %v1651_v2  }
  0x68   : > { %1406 = vset.pattern.permute.xlu0 %v1534_v21 }
  0x69   : > { %280 = vperm.xlu0 %1406, %v1651_v2  }
  0x6a   : > { %1395 = vset.pattern.permute.xlu1 %v1531_v10 }
  0x6b   : > { %603 = vperm.xlu1 %1395, %v1651_v2  }
  0x6d   : > { %295 = vperm.xlu0 %1406, %v1657_v4  }
  0x6f   : > { %607 = vperm.xlu1 %1395, %v1659_v5  }
  0x71   : > { %1408 = vset.pattern.permute.xlu0 %v1535_v22 }
  0x72   : > { %383 = vperm.xlu0 %1408, %v1651_v2  }
  0x73   : > { %1396 = vset.pattern.permute.xlu1 %v1526_v1 }
  0x74   : > { %443 = vperm.xlu1 %1396, %v1651_v2  }
  0x76   : > { %1412 = vset.pattern.permute.xlu0 %v1536_v23 }
  0x78   : > { %447 = vperm.xlu1 %1396, %v1659_v5  }
  0x7c   : > { %1397 = vset.pattern.permute.xlu1 %v1532_v13 }
  0x7d   : > { %647 = vperm.xlu1 %1397, %v1659_v5  }
  0x81   : > { %1400 = vset.pattern.permute.xlu1 %v1531_v10 }
  0x82   : > { %615 = vperm.xlu1 %1400, %v1657_v4  }
  0x86   : > { %1401 = vset.pattern.permute.xlu1 %v1532_v13 }
  0x87   : > { %651 = vperm.xlu1 %1401, %v1653_v3  }
  0x8b   : > { %1402 = vset.pattern.permute.xlu1 %v1535_v22 }
  0x8c   : > { %391 = vperm.xlu1 %1402, %v1653_v3  }
  0x90   : > { %395 = vperm.xlu1 %1402, %v1657_v4  }
  0x94   : > { %1403 = vset.pattern.permute.xlu1 %v1533_v19 }
  0x95   : > { %483 = vperm.xlu1 %1403, %v1651_v2  }
  0x99   : > { %1404 = vset.pattern.permute.xlu1 %v1534_v21 }
  0x9a   : > { %285 = vperm.xlu1 %1404, %v1659_v5  }
  0x9e   : > { %290 = vperm.xlu1 %1404, %v1653_v3  }
  0xa2   : > { %1407 = vset.pattern.permute.xlu1 %v1533_v19 }
  0xa3   : > { %491 = vperm.xlu1 %1407, %v1653_v3  }
  0xa7   : > { %495 = vperm.xlu1 %1407, %v1657_v4  }
  0xa8   : > { %v304_v24 = vpop.permute.xlu0 %303  ;;  %v452_v25 = vpop.permute.xlu1 %451 }
  0xa9   : > { %v460_v40 = vmul.f32 %v452_v25, %v1695_v18  ;;  %v318_v43 = vmul.f32 %v304_v24, %v1688_v16 }
  0xab   : > { %1409 = vset.pattern.permute.xlu1 %v1536_v23 }
  0xac   : > { %583 = vperm.xlu1 %1409, %v1651_v2   ;;  %v456_v27 = vpop.permute.xlu1 %455 }
  0xad   : > { %v508_v26 = vpop.permute.xlu0 %507  ;;  %v461_v44 = vmul.f32 %v456_v27, %v1702_v20 }
  0xae   : > { %v519_v49 = vmul.f32 %v508_v26, %v1693_v17 }
  0xb0   : > { %1410 = vset.pattern.permute.xlu1 %v1535_v22 }
  0xb1   : > { %v512_v28 = vpop.permute.xlu0 %511  ;;  %387 = vperm.xlu1 %1410, %v1659_v5   ;;  %v504_v29 = vpop.permute.xlu1 %503 }
  0xb2   : > { %v518_v46 = vmul.f32 %v504_v29, %v1688_v16  ;;  %v520_v56 = vmul.f32 %v512_v28, %v1695_v18 }
  0xb5   : > { %1411 = vset.pattern.permute.xlu1 %v1536_v23 }
  0xb6   : > { %v348_v30 = vpop.permute.xlu0 %347  ;;  %v308_v31 = vpop.permute.xlu1 %307 }
  0xb7   : > { %v319_v47 = vmul.f32 %v308_v31, %v1693_v17  ;;  %v359_v54 = vmul.f32 %v348_v30, %v1693_v17 }
  0xba   : > { %v352_v32 = vpop.permute.xlu0 %351 }
  0xbb   : > { %v344_v33 = vpop.permute.xlu1 %343  ;;  %v360_v62 = vmul.f32 %v352_v32, %v1695_v18 }
  0xbc   : > { %v358_v50 = vmul.f32 %v344_v33, %v1688_v16 }
  0xbf   : > { %v556_v34 = vpop.permute.xlu0 %555 }
  0xc0   : > { %v544_v35 = vpop.permute.xlu1 %543 }
  0xc1   : > { %v558_v52 = vmul.f32 %v544_v35, %v1688_v16 }
  0xc4   : > { %v412_v36 = vpop.permute.xlu0 %411  ;;  %v548_v37 = vpop.permute.xlu1 %547 }
  0xc5   : > { %v420_v38 = vmul.f32 %v412_v36, %v1695_v18  ;;  %v559_v55 = vmul.f32 %v548_v37, %v1693_v17 }
  0xc7   : > { %430 = vrot.lane.b32.xlu1 %v420_v38, %s1537_s27 }
  0xc8   : > { %v416_v39 = vpop.permute.xlu0 %415 }
  0xc9   : > { %v421_v41 = vmul.f32 %v416_v39, %v1702_v20  ;;  %v312_v42 = vpop.permute.xlu1 %311 }
  0xca   : > { %v320_v57 = vmul.f32 %v312_v42, %v1695_v18 }
  0xcb   : > { %432 = vrot.lane.b32.xlu0 %v421_v41, %s1537_s27  ;;  %470 = vrot.lane.b32.xlu1 %v460_v40, %s1538_s6 }
  0xcc   : > { %v408_v1 = vpop.permute.xlu0 %407 }
  0xcd   : > { %v316_v45 = vpop.permute.xlu1 %315  ;;  %v419_v11 = vmul.f32 %v408_v1, %v1693_v17 }
  0xce   : > { %v321_v59 = vmul.f32 %v316_v45, %v1702_v20 }
  0xcf   : > { %472 = vrot.lane.b32.xlu0 %v461_v44, %s1538_s6  ;;  %326 = vrot.lane.b32.xlu1 %v318_v43, %s1537_s27 }
  0xd1   : > { %v612_v7 = vpop.permute.xlu0 %611 }
  0xd2   : > { %v516_v48 = vpop.permute.xlu1 %515  ;;  %v620_v24 = vmul.f32 %v612_v7, %v1695_v18 }
  0xd3   : > { %526 = vrot.lane.b32.xlu0 %v518_v46, %s1537_s27  ;;  %328 = vrot.lane.b32.xlu1 %v319_v47, %s1537_s27  ;;  %v521_v60 = vmul.f32 %v516_v48, %v1702_v20 }
  0xd7   : > { %366 = vrot.lane.b32.xlu0 %v358_v50, %s1538_s6  ;;  %528 = vrot.lane.b32.xlu1 %v519_v49, %s1537_s27  ;;  %v552_v51 = vpop.permute.xlu1 %551 }
  0xd8   : > { %v560_v0 = vmul.f32 %v552_v51, %v1695_v18 }
  0xdb   : > { %566 = vrot.lane.b32.xlu0 %v558_v52, %s1538_s6  ;;  %587 = vperm.xlu1 %1411, %v1659_v5   ;;  %v561_v5 = vmul.f32 %v556_v34, %v1702_v20 }
  0xdc   : > { %v356_v53 = vpop.permute.xlu1 %355 }
  0xdd   : > { %v361_v6 = vmul.f32 %v356_v53, %v1702_v20 }
  0xdf   : > { %368 = vrot.lane.b32.xlu0 %v359_v54, %s1538_s6  ;;  %568 = vrot.lane.b32.xlu1 %v559_v55, %s1538_s6 }
  0xe1   : > { %v404_v58 = vpop.permute.xlu1 %403 }
  0xe2   : > { %v418_v9 = vmul.f32 %v404_v58, %v1688_v16 }
  0xe3   : > { %330 = vrot.lane.b32.xlu0 %v320_v57, %s1537_s27  ;;  %530 = vrot.lane.b32.xlu1 %v520_v56, %s1537_s27 }
  0xe6   : > { %v604_v61 = vpop.permute.xlu1 %603 }
  0xe7   : > { %332 = vrot.lane.b32.xlu0 %v321_v59, %s1537_s27  ;;  %532 = vrot.lane.b32.xlu1 %v521_v60, %s1537_s27  ;;  %v618_v8 = vmul.f32 %v604_v61, %v1688_v16 }
  0xea   : > { %v608_v63 = vpop.permute.xlu1 %607 }
  0xeb   : > { %591 = vperm.xlu0 %1412, %v1653_v3   ;;  %370 = vrot.lane.b32.xlu1 %v360_v62, %s1538_s6  ;;  %v619_v12 = vmul.f32 %v608_v63, %v1693_v17 }
  0xef   : > { %595 = vperm.xlu0 %1412, %v1657_v4   ;;  %570 = vrot.lane.b32.xlu1 %v560_v0, %s1538_s6  ;;  %v444_v2 = vpop.permute.xlu1 %443  ;;  %v644_v4 = vpop.permute.xlu0 %643 }
  0xf0   : > { %v458_v14 = vmul.f32 %v444_v2, %v1688_v16 }
  0xf3   : > { %572 = vrot.lane.b32.xlu0 %v561_v5, %s1538_s6  ;;  %372 = vrot.lane.b32.xlu1 %v361_v6, %s1538_s6  ;;  %v448_v3 = vpop.permute.xlu1 %447  ;;  %v656_v25 = vpop.permute.xlu0 %655 }
  0xf4   : > { %1413 = vset.pattern.permute.xlu0 %v1532_v13  ;;  %v658_v13 = vmul.f32 %v644_v4, %v1688_v16  ;;  %v459_v21 = vmul.f32 %v448_v3, %v1693_v17  ;;  %v661_v28 = vmul.f32 %v656_v25, %v1702_v20 }
  0xf7   : > { %626 = vrot.lane.b32.xlu0 %v618_v8, %s1537_s27  ;;  %426 = vrot.lane.b32.xlu1 %v418_v9, %s1537_s27  ;;  %v488_v34 = vpop.permute.xlu0 %487 }
  0xf8   : > { %v648_v10 = vpop.permute.xlu1 %647  ;;  %v499_v6 = vmul.f32 %v488_v34, %v1693_v17 }
  0xf9   : > { %v659_v19 = vmul.f32 %v648_v10, %v1693_v17 }
  0xfb   : > { %628 = vrot.lane.b32.xlu0 %v619_v12, %s1537_s27  ;;  %428 = vrot.lane.b32.xlu1 %v419_v11, %s1537_s27  ;;  %v281_v36 = vpop.permute.xlu0 %280 }
  0xfc   : > { %v298_v53 = vmul.f32 %v281_v36, %v1688_v16 }
  0xfd   : > { %v616_v15 = vpop.permute.xlu1 %615 }
  0xfe   : > { %v621_v23 = vmul.f32 %v616_v15, %v1702_v20 }
  0xff   : > { %666 = vrot.lane.b32.xlu0 %v658_v13, %s1538_s6  ;;  %466 = vrot.lane.b32.xlu1 %v458_v14, %s1538_s6  ;;  %v296_v38 = vpop.permute.xlu0 %295 }
 0x102   : > { %v652_v22 = vpop.permute.xlu1 %651 }
 0x103   : > { %668 = vrot.lane.b32.xlu0 %v659_v19, %s1538_s6  ;;  %468 = vrot.lane.b32.xlu1 %v459_v21, %s1538_s6  ;;  %v660_v26 = vmul.f32 %v652_v22, %v1695_v18  ;;  %v1804_v40 = vpop.permute.xlu0 %383 }
 0x107   : > { %632 = vrot.lane.b32.xlu0 %v621_v23, %s1537_s27  ;;  %630 = vrot.lane.b32.xlu1 %v620_v24, %s1537_s27  ;;  %v392_v27 = vpop.permute.xlu1 %391 }
 0x108   : > { %v400_v42 = vmul.f32 %v392_v27, %v1695_v18 }
 0x10b   : > { %672 = vrot.lane.b32.xlu0 %v661_v28, %s1538_s6  ;;  %670 = vrot.lane.b32.xlu1 %v660_v26, %s1538_s6  ;;  %v396_v29 = vpop.permute.xlu1 %395  ;;  %v301_v26 = vmul.f32 %v296_v38, %v1702_v20  ;;  %v398_v38 = vmul.f32 %v1804_v40, %v1688_v16 }
 0x10c   : > { %v401_v46 = vmul.f32 %v396_v29, %v1702_v20 }
 0x110   : > { %v484_v30 = vpop.permute.xlu1 %483 }
 0x111   : > { %v498_v56 = vmul.f32 %v484_v30, %v1688_v16 }
 0x115   : > { %v286_v31 = vpop.permute.xlu1 %285 }
 0x116   : > { %v299_v61 = vmul.f32 %v286_v31, %v1693_v17 }
 0x119   : > { %v291_v32 = vpop.permute.xlu1 %290 }
 0x11a   : > { %v300_v12 = vmul.f32 %v291_v32, %v1695_v18 }
 0x11e   : > { %v492_v33 = vpop.permute.xlu1 %491 }
 0x11f   : > { %v500_v19 = vmul.f32 %v492_v33, %v1695_v18 }
 0x122   : > { %v496_v35 = vpop.permute.xlu1 %495 }
 0x123   : > { %v501_v25 = vmul.f32 %v496_v35, %v1702_v20 }
 0x127   : > { %v1800_v37 = vpop.permute.xlu1 %583 }
 0x128   : > { %v598_v35 = vmul.f32 %v1800_v37, %v1688_v16 }
 0x12c   : > { %v1802_v39 = vpop.permute.xlu1 %387 }
 0x139   : > { %v431_v41 = vpop.permute.xlu1 %430 }
 0x13a   : > { %v440_v43 = vadd.f32 %v431_v41, %v400_v42 }
 0x13d   : > { %v433_v44 = vpop.permute.xlu0 %432  ;;  %v471_v45 = vpop.permute.xlu1 %470 }
 0x13e   : > { %v480_v47 = vadd.f32 %v471_v45, %v440_v43  ;;  %v441_v48 = vadd.f32 %v433_v44, %v401_v46 }
 0x140   : > { %702 = vrot.lane.b32.xlu1 %v480_v47, %s1537_s27  ;;  %v399_v47 = vmul.f32 %v1802_v39, %v1693_v17 }
 0x141   : > { %v473_v49 = vpop.permute.xlu0 %472  ;;  %v327_v51 = vpop.permute.xlu1 %326 }
 0x142   : > { %v481_v50 = vadd.f32 %v473_v49, %v441_v48  ;;  %v338_v54 = vadd.f32 %v327_v51, %v298_v53 }
 0x144   : > { %704 = vrot.lane.b32.xlu0 %v481_v50, %s1537_s27 }
 0x145   : > { %v527_v52 = vpop.permute.xlu0 %526  ;;  %v329_v59 = vpop.permute.xlu1 %328 }
 0x146   : > { %v538_v58 = vadd.f32 %v527_v52, %v498_v56  ;;  %v339_v63 = vadd.f32 %v329_v59, %v299_v61 }
 0x149   : > { %v367_v55 = vpop.permute.xlu0 %366  ;;  %v529_v1 = vpop.permute.xlu1 %528 }
 0x14a   : > { %v378_v57 = vadd.f32 %v367_v55, %v338_v54  ;;  %v539_v7 = vadd.f32 %v529_v1, %v499_v6  ;;  %v1847_v1 = vstv %s269_s7 }
 0x14c   : > { %686 = vrot.lane.b32.xlu1 %v378_v57, %s1537_s27 }
 0x14d   : > { %v567_v60 = vpop.permute.xlu0 %566 }
 0x14e   : > { %v578_v62 = vadd.f32 %v567_v60, %v538_v58 }
 0x150   : > { %710 = vrot.lane.b32.xlu0 %v578_v62, %s1537_s27  ;;  %v1276_v62 = vpop.f32.mrf.mxu0 }
 0x151   : > { %v369_v0 = vpop.permute.xlu0 %368 }
 0x152   : > { %v379_v2 = vadd.f32 %v369_v0, %v339_v63  ;;  %v847_v63 = vpop.f32.mrf.mxu0  ;;  %v1844_v0 = vld [vmem:[%s1989_s4] ss:$0 sm:$0xff] }
 0x154   : > { %688 = vrot.lane.b32.xlu1 %v379_v2, %s1537_s27 }
 0x155   : > { %v331_v9 = vpop.permute.xlu0 %330 }
 0x156   : > { %v588_v5 = vpop.permute.xlu1 %587  ;;  %v340_v14 = vadd.f32 %v331_v9, %v300_v12 }
 0x157   : > { %v599_v48 = vmul.f32 %v588_v5, %v1693_v17 }
 0x159   : > { %v333_v10 = vpop.permute.xlu0 %332 }
 0x15a   : > { %v569_v8 = vpop.permute.xlu1 %568  ;;  %v341_v28 = vadd.f32 %v333_v10, %v301_v26 }
 0x15b   : > { %v579_v3 = vadd.f32 %v569_v8, %v539_v7  ;;  %v848_v7 = vadd.f32 %v1844_v0, %v847_v63 }
 0x15d   : > { %712 = vrot.lane.b32.xlu0 %v579_v3, %s1537_s27  ;;  %v967_v9 = vmul.f32 %v1847_v1, %v848_v7  ;;  %vm946_vm3 = vcmp.ge.f32.partialorder %v848_v7, 0.0 }
 0x15e   : > { %v531_v4 = vpop.permute.xlu1 %530 }
 0x15f   : > { %v540_v22 = vadd.f32 %v531_v4, %v500_v19 }
 0x162   : > { %v533_v11 = vpop.permute.xlu1 %532 }
 0x163   : > { %v541_v29 = vadd.f32 %v533_v11, %v501_v25 }
 0x166   : > { %v592_v13 = vpop.permute.xlu0 %591  ;;  %v371_v15 = vpop.permute.xlu1 %370 }
 0x167   : > { %v380_v21 = vadd.f32 %v371_v15, %v340_v14  ;;  %v600_v17 = vmul.f32 %v592_v13, %v1695_v18  ;;  %v1279_v18 = vpop.f32.mrf.mxu0  ;;  %v987_v14 = vsel %vm946_vm3, %v848_v7, %v967_v9 }
 0x168   : > { %v863_v4 = vadd.f32 %v1279_v18, %v1844_v0  ;;  %v1052_v19 = vmul.f32 %v987_v14, %v987_v14 }
 0x169   : > { %690 = vrot.lane.b32.xlu1 %v380_v21, %s1537_s27  ;;  %v857_v2 = vpop.f32.mrf.mxu0 }
 0x16a   : > { %v596_v23 = vpop.permute.xlu0 %595  ;;  %v571_v24 = vpop.permute.xlu1 %570  ;;  %v858_v6 = vadd.f32 %v1844_v0, %v857_v2  ;;  %v970_v12 = vmul.f32 %v1847_v1, %v863_v4  ;;  %vm949_vm5 = vcmp.ge.f32.partialorder %v863_v4, 0.0 }
 0x16b   : > { %v580_v27 = vadd.f32 %v571_v24, %v540_v22  ;;  %v601_v55 = vmul.f32 %v596_v23, %v1702_v20  ;;  %v853_v20 = vadd.f32 %v1276_v62, %v1844_v0  ;;  %v1056_v23 = vsel %vm1027_vm4, %v1052_v19, 0.0 }
 0x16c   : > { %v969_v3 = vmul.f32 %v1847_v1, %v858_v6  ;;  %vm948_vm2 = vcmp.ge.f32.partialorder %v858_v6, 0.0  ;;  %v1865_v21 = vsel %vm949_vm5, %v863_v4, %v970_v12 }
 0x16d   : > { %714 = vrot.lane.b32.xlu0 %v580_v27, %s1537_s27  ;;  %v968_v5 = vmul.f32 %v1847_v1, %v853_v20  ;;  %vm947_vm1 = vcmp.ge.f32.partialorder %v853_v20, 0.0  ;;  %v1055_v24 = vmul.f32 %v1865_v21, %v1865_v21 }
 0x16e   : > { %v573_v30 = vpop.permute.xlu0 %572  ;;  %v373_v31 = vpop.permute.xlu1 %372  ;;  %v1859_v11 = vsel %vm948_vm2, %v858_v6, %v969_v3 }
 0x16f   : > { %v581_v32 = vadd.f32 %v573_v30, %v541_v29  ;;  %v381_v34 = vadd.f32 %v373_v31, %v341_v28  ;;  %v1852_v8 = vsel %vm947_vm1, %v853_v20, %v968_v5  ;;  %v1054_v15 = vmul.f32 %v1859_v11, %v1859_v11 }
 0x170   : > { %v1053_v10 = vmul.f32 %v1852_v8, %v1852_v8  ;;  %v1065_v25 = vsel %vm1027_vm4, %v1055_v24, 0.0 }
 0x171   : > { %716 = vrot.lane.b32.xlu0 %v581_v32, %s1537_s27  ;;  %692 = vrot.lane.b32.xlu1 %v381_v34, %s1537_s27  ;;  %v1062_v22 = vsel %vm1027_vm4, %v1054_v15, 0.0 }
 0x172   : > { %v627_v33 = vpop.permute.xlu0 %626  ;;  %v427_v36 = vpop.permute.xlu1 %426  ;;  %v1059_v13 = vsel %vm1027_vm4, %v1053_v10, 0.0 }
 0x173   : > { %v638_v43 = vadd.f32 %v627_v33, %v598_v35  ;;  %v438_v44 = vadd.f32 %v427_v36, %v398_v38 }
 0x176   : > { %v629_v41 = vpop.permute.xlu0 %628  ;;  %v429_v42 = vpop.permute.xlu1 %428 }
 0x177   : > { %v639_v51 = vadd.f32 %v629_v41, %v599_v48  ;;  %v439_v52 = vadd.f32 %v429_v42, %v399_v47 }
 0x17a   : > { %v667_v45 = vpop.permute.xlu0 %666  ;;  %v467_v46 = vpop.permute.xlu1 %466 }
 0x17b   : > { %v678_v49 = vadd.f32 %v667_v45, %v638_v43  ;;  %v478_v50 = vadd.f32 %v467_v46, %v438_v44 }
 0x17d   : > { %722 = vrot.lane.b32.xlu0 %v678_v49, %s1537_s27  ;;  %698 = vrot.lane.b32.xlu1 %v478_v50, %s1537_s27 }
 0x17e   : > { %v669_v37 = vpop.permute.xlu0 %668  ;;  %v469_v53 = vpop.permute.xlu1 %468 }
 0x17f   : > { %v679_v16 = vadd.f32 %v669_v37, %v639_v51  ;;  %v479_v40 = vadd.f32 %v469_v53, %v439_v52 }
 0x181   : > { %724 = vrot.lane.b32.xlu0 %v679_v16, %s1537_s27  ;;  %700 = vrot.lane.b32.xlu1 %v479_v40, %s1537_s27 }
 0x182   : > { %v633_v54 = vpop.permute.xlu0 %632  ;;  %v631_v39 = vpop.permute.xlu1 %630 }
 0x183   : > { %v641_v56 = vadd.f32 %v633_v54, %v601_v55  ;;  %v640_v57 = vadd.f32 %v631_v39, %v600_v17 }
 0x186   : > { %v673_v58 = vpop.permute.xlu0 %672  ;;  %v671_v59 = vpop.permute.xlu1 %670 }
 0x187   : > { %v681_v60 = vadd.f32 %v673_v58, %v641_v56  ;;  %v680_v61 = vadd.f32 %v671_v59, %v640_v57 }
 0x189   : > { %728 = vrot.lane.b32.xlu0 %v681_v60, %s1537_s27  ;;  %726 = vrot.lane.b32.xlu1 %v680_v61, %s1537_s27 }
 0x1a8   : > { %1060 = vadd.xlane.f32.xlu0 %v1059_v13 }
 0x1ac   : > { %1063 = vadd.xlane.f32.xlu0 %v1062_v22 }
 0x1ad   : > { %1057 = vadd.xlane.f32.xlu1 %v1056_v23 }
 0x1b1   : > { %1066 = vadd.xlane.f32.xlu1 %v1065_v25 }
 0x1b2   : > { %v703_v26 = vpop.permute.xlu1 %702 }
 0x1b3   : > { %1289 = vmatprep.mubr.msk.f32.mxu1 %vm736_vm0, %v703_v26 }
 0x1b6   : > { %v705_v27 = vpop.permute.xlu0 %704 }
 0x1b7   : > { %1290 = vmatmul.mubr.msk.f32.vlgmr.msra.gmra.mxu1 %vm736_vm0, %v705_v27 }
 0x1be   : > { %v687_v28 = vpop.permute.xlu1 %686 }
 0x1bf   : > { %1280 = vmatprep.mubr.msk.f32.mxu0 %vm736_vm0, %v687_v28 }
 0x1c2   : > { %v711_v29 = vpop.permute.xlu0 %710 }
 0x1c3   : > { %1292 = vmatprep.mubr.msk.f32.mxu1 %vm736_vm0, %v711_v29 }
 0x1c6   : > { %v689_v30 = vpop.permute.xlu1 %688 }
 0x1c7   : > { %1281 = vmatmul.mubr.msk.f32.gmra.mxu0 %vm736_vm0, %v689_v30 }
 0x1cf   : > { %v713_v31 = vpop.permute.xlu0 %712 }
 0x1d0   : > { %1293 = vmatmul.mubr.msk.f32.gmra.mxu1 %vm736_vm0, %v713_v31 }
 0x1db   : > { %v691_v32 = vpop.permute.xlu1 %690 }
 0x1dc   : > { %1283 = vmatprep.mubr.msk.f32.mxu0 %vm736_vm0, %v691_v32 }
 0x1df   : > { %v715_v34 = vpop.permute.xlu0 %714 }
 0x1e0   : > { %1295 = vmatprep.mubr.msk.f32.mxu1 %vm736_vm0, %v715_v34 }
 0x1e3   : > { %v717_v33 = vpop.permute.xlu0 %716  ;;  %v693_v36 = vpop.permute.xlu1 %692 }
 0x1e4   : > { %1284 = vmatmul.mubr.msk.f32.gmra.mxu0 %vm736_vm0, %v693_v36  ;;  %1296 = vmatmul.mubr.msk.f32.gmra.mxu1 %vm736_vm0, %v717_v33 }
 0x1ef   : > { %v723_v41 = vpop.permute.xlu0 %722  ;;  %v699_v42 = vpop.permute.xlu1 %698 }
 0x1f0   : > { %1286 = vmatprep.mubr.msk.f32.mxu0 %vm736_vm0, %v699_v42  ;;  %1298 = vmatprep.mubr.msk.f32.mxu1 %vm736_vm0, %v723_v41 }
 0x1f3   : > { %v725_v35 = vpop.permute.xlu0 %724  ;;  %v701_v38 = vpop.permute.xlu1 %700 }
 0x1f4   : > { %1287 = vmatmul.mubr.msk.f32.gmra.mxu0 %vm736_vm0, %v701_v38  ;;  %1299 = vmatmul.mubr.msk.f32.gmra.mxu1 %vm736_vm0, %v725_v35 }
 0x1fb   : > { %v729_v43 = vpop.permute.xlu0 %728  ;;  %v727_v44 = vpop.permute.xlu1 %726 }
 0x1fc   : > { %1301 = vmatprep.mubr.msk.f32.mxu1 %vm736_vm0, %v727_v44 }
 0x1fd   : > { %1302 = vmatmul.mubr.msk.f32.gmra.mxu1 %vm736_vm0, %v729_v43 }
 0x231   : > { %v1061_v45 = vpop.xlane.xlu0 %1060 }
 0x232   : > { %v1069_v46 = vmax.f32 %v1061_v45, 1e-24 }
 0x234   : > { %1414 = vrsqrt.f32 %v1069_v46 }
 0x236   : > { %v1058_v47 = vpop.xlane.xlu1 %1057 }
 0x237   : > { %v1068_v48 = vmax.f32 %v1058_v47, 1e-24 }
 0x239   : > { %1416 = vrsqrt.f32 %v1068_v48 }
 0x241   : > { %v1415_v49 = vpop.eup %1414 }
 0x242   : > { %v1077_v50 = vmul.f32 %v1415_v49, %v1852_v8 }
 0x244   : > { %1086 = vrot.lane.b32.xlu1 %v1077_v50, %s1538_s6 }
 0x246   : > { %v1417_v51 = vpop.eup %1416 }
 0x247   : > { %v1076_v52 = vmul.f32 %v1417_v51, %v987_v14 }
 0x249   : > { %1084 = vrot.lane.b32.xlu0 %v1076_v52, %s1538_s6 }
 0x277   : > { %v1291_v37 = vpop.f32.mrf.mxu1 }
 0x278   : > { %v903_v39 = vadd.f32 %v1291_v37, %v1844_v0 }
 0x279   : > { %v897_v53 = vpop.f32.mrf.mxu1 }
 0x27a   : > { %v898_v55 = vadd.f32 %v1844_v0, %v897_v53  ;;  %v978_v61 = vmul.f32 %v1847_v1, %v903_v39  ;;  %vm957_vm6 = vcmp.ge.f32.partialorder %v903_v39, 0.0 }
 0x27c   : > { %v977_v62 = vmul.f32 %v1847_v1, %v898_v55  ;;  %vm956_vm7 = vcmp.ge.f32.partialorder %v898_v55, 0.0  ;;  %v998_v8 = vsel %vm957_vm6, %v903_v39, %v978_v61 }
 0x27e   : > { %v997_v10 = vsel %vm956_vm7, %v898_v55, %v977_v62 }
 0x287   : > { %v1282_v16 = vpop.f32.mrf.mxu0 }
 0x288   : > { %v873_v57 = vadd.f32 %v1282_v16, %v1844_v0 }
 0x289   : > { %v867_v54 = vpop.f32.mrf.mxu0 }
 0x28a   : > { %v868_v58 = vadd.f32 %v1844_v0, %v867_v54  ;;  %v972_v20 = vmul.f32 %v1847_v1, %v873_v57  ;;  %vm951_vm8 = vcmp.ge.f32.partialorder %v873_v57, 0.0 }
 0x28c   : > { %v971_v2 = vmul.f32 %v1847_v1, %v868_v58  ;;  %vm950_vm9 = vcmp.ge.f32.partialorder %v868_v58, 0.0  ;;  %v992_v15 = vsel %vm951_vm8, %v873_v57, %v972_v20 }
 0x28e   : > { %v991_v19 = vsel %vm950_vm9, %v868_v58, %v971_v2 }
 0x290   : > { %v1294_v40 = vpop.f32.mrf.mxu1 }
 0x291   : > { %v913_v59 = vadd.f32 %v1294_v40, %v1844_v0 }
 0x292   : > { %v907_v17 = vpop.f32.mrf.mxu1 }
 0x293   : > { %v980_v5 = vmul.f32 %v1847_v1, %v913_v59  ;;  %vm959_vm10 = vcmp.ge.f32.partialorder %v913_v59, 0.0  ;;  %v908_v7 = vadd.f32 %v1844_v0, %v907_v17 }
 0x295   : > { %v1000_v22 = vsel %vm959_vm10, %v913_v59, %v980_v5  ;;  %v979_v25 = vmul.f32 %v1847_v1, %v908_v7  ;;  %vm958_vm0 = vcmp.ge.f32.partialorder %v908_v7, 0.0  ;;  %v1064_v59 = vpop.xlane.xlu0 %1063 }
 0x297   : > { %v999_v50 = vsel %vm958_vm0, %v908_v7, %v979_v25 }
 0x2a4   : > { %v1285_v56 = vpop.f32.mrf.mxu0  ;;  %v1297_v60 = vpop.f32.mrf.mxu1 }
 0x2a5   : > { %v883_v63 = vadd.f32 %v1285_v56, %v1844_v0  ;;  %v923_v26 = vadd.f32 %v1297_v60, %v1844_v0 }
 0x2a6   : > { %v877_v18 = vpop.f32.mrf.mxu0  ;;  %v917_v6 = vpop.f32.mrf.mxu1 }
 0x2a7   : > { %v878_v3 = vadd.f32 %v1844_v0, %v877_v18  ;;  %v974_v12 = vmul.f32 %v1847_v1, %v883_v63  ;;  %vm953_vm11 = vcmp.ge.f32.partialorder %v883_v63, 0.0  ;;  %v918_v29 = vadd.f32 %v1844_v0, %v917_v6 }
 0x2a8   : > { %vm961_vm1 = vcmp.ge.f32.partialorder %v923_v26, 0.0  ;;  %v982_v42 = vmul.f32 %v1847_v1, %v923_v26  ;;  %v1070_v6 = vmax.f32 %v1064_v59, 1e-24 }
 0x2a9   : > { %v973_v28 = vmul.f32 %v1847_v1, %v878_v3  ;;  %v994_v32 = vsel %vm953_vm11, %v883_v63, %v974_v12  ;;  %vm952_vm13 = vcmp.ge.f32.partialorder %v878_v3, 0.0  ;;  %v981_v46 = vmul.f32 %v1847_v1, %v918_v29 }
 0x2aa   : > { %v1010_v45 = vadd.f32 %v998_v8, %v994_v32  ;;  %vm960_vm3 = vcmp.ge.f32.partialorder %v918_v29, 0.0  ;;  %v1002_v37 = vsel %vm961_vm1, %v923_v26, %v982_v42  ;;  %1418 = vrsqrt.f32 %v1070_v6 }
 0x2ab   : > { %v993_v38 = vsel %vm952_vm13, %v878_v3, %v973_v28  ;;  %v1001_v57 = vsel %vm960_vm3, %v918_v29, %v981_v46 }
 0x2ac   : > { %v1009_v53 = vadd.f32 %v997_v10, %v993_v38  ;;  %v1014_v56 = vadd.f32 %v1010_v45, %v1002_v37  ;;  %v1067_v10 = vpop.xlane.xlu1 %1066 }
 0x2ae   : > { %v1013_v63 = vadd.f32 %v1009_v53, %v1001_v57 }
 0x2b4   : > { %v1288_v9 = vpop.f32.mrf.mxu0  ;;  %v1300_v4 = vpop.f32.mrf.mxu1 }
 0x2b5   : > { %v893_v14 = vadd.f32 %v1288_v9, %v1844_v0  ;;  %v933_v13 = vadd.f32 %v1300_v4, %v1844_v0 }
 0x2b6   : > { %v887_v23 = vpop.f32.mrf.mxu0  ;;  %v927_v24 = vpop.f32.mrf.mxu1 }
 0x2b7   : > { %vm955_vm12 = vcmp.ge.f32.partialorder %v893_v14, 0.0  ;;  %v976_v27 = vmul.f32 %v1847_v1, %v893_v14  ;;  %v888_v30 = vadd.f32 %v1844_v0, %v887_v23  ;;  %v928_v31 = vadd.f32 %v1844_v0, %v927_v24  ;;  %v1087_v24 = vpop.permute.xlu1 %1086 }
 0x2b8   : > { %v984_v33 = vmul.f32 %v1847_v1, %v933_v13  ;;  %vm963_vm14 = vcmp.ge.f32.partialorder %v933_v13, 0.0 }
 0x2b9   : > { %v996_v34 = vsel %vm955_vm12, %v893_v14, %v976_v27  ;;  %vm954_vm15 = vcmp.ge.f32.partialorder %v888_v30, 0.0  ;;  %v975_v41 = vmul.f32 %v1847_v1, %v888_v30  ;;  %v983_v35 = vmul.f32 %v1847_v1, %v928_v31 }
 0x2ba   : > { %v1008_v36 = vadd.f32 %v996_v34, %v992_v15  ;;  %vm962_vm2 = vcmp.ge.f32.partialorder %v928_v31, 0.0  ;;  %v1004_v47 = vsel %vm963_vm14, %v933_v13, %v984_v33  ;;  %v1071_v13 = vmax.f32 %v1067_v10, 1e-24  ;;  %v1419_v15 = vpop.eup %1418 }
 0x2bb   : > { %v995_v44 = vsel %vm954_vm15, %v888_v30, %v975_v41  ;;  %v1003_v16 = vsel %vm962_vm2, %v928_v31, %v983_v35  ;;  %v1085_v25 = vpop.permute.xlu0 %1084 }
 0x2bc   : > { %v1012_v43 = vadd.f32 %v1008_v36, %v1000_v22  ;;  %v1007_v48 = vadd.f32 %v995_v44, %v991_v19  ;;  %1420 = vrsqrt.f32 %v1071_v13  ;;  %v1078_v19 = vmul.f32 %v1419_v15, %v1859_v11 }
 0x2bd   : > { %v1303_v49 = vpop.f32.mrf.mxu1 }
 0x2be   : > { %v1016_v51 = vadd.f32 %v1012_v43, %v1004_v47  ;;  %v943_v52 = vadd.f32 %v1303_v49, %v1844_v0  ;;  %v1011_v54 = vadd.f32 %v1007_v48, %v999_v50 }
 0x2bf   : > { %v937_v40 = vpop.f32.mrf.mxu1 }
 0x2c0   : > { %vm965_vm5 = vcmp.ge.f32.partialorder %v943_v52, 0.0  ;;  %v986_v39 = vmul.f32 %v1847_v1, %v943_v52  ;;  %v938_v17 = vadd.f32 %v1844_v0, %v937_v40  ;;  %v1020_v55 = vmul.f32 0.25, %v1016_v51 }
 0x2c1   : > { %v1015_v58 = vadd.f32 %v1011_v54, %v1003_v16 }
 0x2c2   : > { %v1006_v60 = vsel %vm965_vm5, %v943_v52, %v986_v39  ;;  %vm964_vm6 = vcmp.ge.f32.partialorder %v938_v17, 0.0  ;;  %v985_v61 = vmul.f32 %v1847_v1, %v938_v17  ;;  %v1024_v62 = vmul.f32 %v1020_v55, %v1020_v55 }
 0x2c3   : > { %v1018_v18 = vadd.f32 %v1014_v56, %v1006_v60  ;;  %v1019_v20 = vmul.f32 0.25, %v1015_v58 }
 0x2c4   : > { %v1005_v2 = vsel %vm964_vm6, %v938_v17, %v985_v61  ;;  %v1031_v5 = vsel %vm1027_vm4, %v1024_v62, 0.0 }
 0x2c5   : > { %1032 = vadd.xlane.f32.xlu1 %v1031_v5  ;;  %v1023_v7 = vmul.f32 %v1019_v20, %v1019_v20  ;;  %v1022_v0 = vmul.f32 0.25, %v1018_v18  ;;  %v1017_v8 = vadd.f32 %v1013_v63, %v1005_v2 }
 0x2c7   : > { %v1028_v3 = vsel %vm1027_vm4, %v1023_v7, 0.0  ;;  %v1026_v9 = vmul.f32 %v1022_v0, %v1022_v0  ;;  %v1021_v4 = vmul.f32 0.25, %v1017_v8 }
 0x2c8   : > { %1029 = vadd.xlane.f32.xlu0 %v1028_v3 }
 0x2c9   : > { %v1037_v1 = vsel %vm1027_vm4, %v1026_v9, 0.0  ;;  %v1025_v12 = vmul.f32 %v1021_v4, %v1021_v4  ;;  %v1421_v22 = vpop.eup %1420 }
 0x2ca   : > { %1038 = vadd.xlane.f32.xlu1 %v1037_v1  ;;  %v1079_v23 = vmul.f32 %v1421_v22, %v1865_v21 }
 0x2cb   : > { %v1034_v14 = vsel %vm1027_vm4, %v1025_v12, 0.0 }
 0x2cc   : > { %1035 = vadd.xlane.f32.xlu0 %v1034_v14 }
 0x2db   : > { %1088 = vrot.lane.b32.xlu1 %v1078_v19, %s1538_s6 }
 0x2e2   : > { %1090 = vrot.lane.b32.xlu0 %v1079_v23, %s1538_s6 }
 0x34e   : > { %v1033_v26 = vpop.xlane.xlu1 %1032 }
 0x34f   : > { %v1041_v27 = vmax.f32 %v1033_v26, 1e-24 }
 0x351   : > { %1422 = vrsqrt.f32 %v1041_v27  ;;  %v1030_v28 = vpop.xlane.xlu0 %1029 }
 0x352   : > { %v1040_v29 = vmax.f32 %v1030_v28, 1e-24 }
 0x353   : > { %v1039_v30 = vpop.xlane.xlu1 %1038 }
 0x354   : > { %1424 = vrsqrt.f32 %v1040_v29  ;;  %v1043_v31 = vmax.f32 %v1039_v30, 1e-24 }
 0x355   : > { %v1036_v32 = vpop.xlane.xlu0 %1035 }
 0x356   : > { %1426 = vrsqrt.f32 %v1043_v31  ;;  %v1042_v11 = vmax.f32 %v1036_v32, 1e-24 }
 0x357   : > { %v1089_v47 = vpop.permute.xlu1 %1088 }
 0x358   : > { %1428 = vrsqrt.f32 %v1042_v11 }
 0x359   : > { %v1091_v44 = vpop.permute.xlu0 %1090 }
 0x35e   : > { %v1423_v21 = vpop.eup %1422 }
 0x35f   : > { %v1049_v34 = vmul.f32 %v1423_v21, %v1020_v55 }
 0x361   : > { %v1425_v33 = vpop.eup %1424  ;;  %v1097_v36 = vsel %vm1027_vm4, %v1049_v34, %v1087_v24 }
 0x362   : > { %v1048_v41 = vmul.f32 %v1425_v33, %v1019_v20  ;;  %1101 = vst [vmem:[%s250_s12 + $0x8] sm:$0xff] %v1097_v36 }
 0x363   : > { %v1427_v42 = vpop.eup %1426 }
 0x364   : > { %v1096_v35 = vsel %vm1027_vm4, %v1048_v41, %v1085_v25  ;;  %v1051_v38 = vmul.f32 %v1427_v42, %v1022_v0 }
 0x365   : > { %v1429_v43 = vpop.eup %1428  ;;  %1100 = vst [vmem:[%s250_s12] sm:$0xff] %v1096_v35 }
 0x366   : > { %v1050_v45 = vmul.f32 %v1429_v43, %v1021_v4  ;;  %v1099_v46 = vsel %vm1027_vm4, %v1051_v38, %v1091_v44 }
 0x367   : > { %1103 = vst [vmem:[%s250_s12 + $0x18] sm:$0xff] %v1099_v46 }
 0x368   : > { %v1098_v48 = vsel %vm1027_vm4, %v1050_v45, %v1089_v47 }
 0x369   : > { %1102 = vst [vmem:[%s250_s12 + $0x10] sm:$0xff] %v1098_v48 }
 0x36a   : > { %1469 = shalt.err (!%p1466_p0)
}
 0x36b   : > { %s1470_s27 = scalar_lea.hbm %s1942_s17, 512  ;;  %s1474_s8 = scalar_lea.hbm %s1990_s5, 1024 }
 0x36c   : > { %p1471_p1 = scmp.ne.s32.totalorder %s1942_s17, %s1470_s27  ;;  %p1475_p4 = scmp.lt.s32.totalorder %s1942_s17, %s1990_s5 }
 0x36d   : > { %p1476_p7 = scmp.lt.s32.totalorder %s1474_s8, %s1470_s27 }
 0x36e   : > { %p1472_p2 = pnand %p1471_p1, %p1613_p5 }
 0x36f   : > { %p1477_p6 = por %p1476_p7, %p1475_p4 }
 0x370   : > { %p1473_p3 = pneg %p1472_p2 }
 0x372   : > { %p1478_p8 = pnand %p1477_p6, %p1473_p3 }
 0x374   : > { %1481 = shalt.err (!%p1478_p8)
}
 0x375   : > { %s1540_s11 = smov 128   ;;  %s1541_s12 = smov 8  }
 0x376   : > { %1316 = dma.vmem_to_hbm [thread:$0]  (%p1613_p5), %s1936_s13, 512, %s1942_s17, %s1945_s0, %s1540_s11, %s1540_s11, %s1541_s12  }
 0x377 PF: > { %p1328_p9 = scmp.ge.s32.totalorder %s1520_s23, 2  ;;  %s1133_s14 = sand.u32 1, %s1508_s20  }
 0x378   : > { %p1994_p10 = scmp.ne.s32.totalorder %s1992_s30, 0  ;;  %s1134_s15 = scalar_lea.sflag [#allocation5], %s1133_s14 }
 0x37a   : > { %p1323_p11 = pnand %p1328_p9, %p1994_p10 }
 0x37c   : > { %p1324_p12 = pneg %p1323_p11 }
 0x37e   : > { %1503 = dma.done.wait (%p1324_p12), %s1134_s15, 512  }
 0x37f   : > { %1505 = vsyncadd (%p1324_p12), %s1134_s15, 4294966784  ;;  %p17_p13 = scmp.ge.s32.totalorder %s1600_s25, 4   ;;  %s1995_s20 = smov %s1512_s21 }
 0x380   : > { %s1996_s21 = smov %s1516_s22  ;;  %s1997_s22 = smov %s1611_s28 }
 0x381   : > { %s1998_s23 = smov %s1600_s25  ;;  %19 = sbr.rel (!%p17_p13) target bundleno = 6 (0x6), region = 83 }
 0x386   :  { %1139 = vsyncpa [#allocation4], 1 }
 0x387   :  { %1141 = vsyncpa [#allocation4 + $0x1], 1 }
 0x388   :  { %1142 = vsyncpa [#allocation5], 1 }
 0x389   :  { %1144 = vsyncpa [#allocation5 + $0x1], 1 }

</bundles_post_ra>
